<compile_context>
chip_gen: v7x
topology: tpu7x:2x2x1
jax: 0.10.0
libtpu: 0.0.40
codegen_flags: <defaults>
</compile_context>

<pallas_src>
import functools
import math

import jax
import jax.numpy as jnp
from jax.experimental import pallas as pl
from jax.experimental.pallas import tpu as pltpu


def _boundary_loss_kernel(pred_ref, tgt_ref, out_ref, *, H, W, G, boundary_weight):
    R, GW = tgt_ref.shape                       # R = TB*H rows, GW = G*W lanes

    t = tgt_ref[...].astype(jnp.float32)        # mask values (any nonzero = fg)

    # ---- interior mask, built in-kernel (no extra HBM input). A pixel may be
    # eroded only if it is strictly inside its own (H, W) image; this also
    # makes the circular-roll wrap-around between packed/stacked images
    # harmless.
    col = jax.lax.broadcasted_iota(jnp.int32, (R, GW), 1)
    if G == 1:
        col_ok = (col > 0) & (col < W - 1)
    elif (W & (W - 1)) == 0:                    # packed, power-of-two width
        cw = col & (W - 1)
        col_ok = (cw > 0) & (cw < W - 1)
    else:                                       # packed, general width: short
        border = col == 0                       # static OR-chain over G images
        for g in range(G):
            border = border | (col == g * W) | (col == (g + 1) * W - 1)
        col_ok = jnp.logical_not(border)

    if (H & (H - 1)) == 0:                      # power-of-two height
        row = jax.lax.broadcasted_iota(jnp.int32, (R, GW), 0)
        rw = row & (H - 1)
    else:                                       # row-within-image via 3-D iota
        rw = jax.lax.broadcasted_iota(jnp.int32, (R // H, H, GW), 1).reshape(R, GW)
    row_ok = (rw > 0) & (rw < H - 1)

    # ---- cross-shaped binary erosion with non-negative circular rolls.
    er = row_ok & col_ok & (t != 0.0)
    er = er & (pltpu.roll(t, shift=1,      axis=0) != 0.0)   # t[r-1, c]
    er = er & (pltpu.roll(t, shift=R - 1,  axis=0) != 0.0)   # t[r+1, c]
    er = er & (pltpu.roll(t, shift=1,      axis=1) != 0.0)   # t[r, c-1]
    er = er & (pltpu.roll(t, shift=GW - 1, axis=1) != 0.0)   # t[r, c+1]
    boundary = t - er.astype(jnp.float32)

    # ---- BCEWithLogitsLoss(reduction='none'), stable torch form.
    # Predictions loaded late to keep peak VMEM liveness low.
    x = pred_ref[...].astype(jnp.float32)
    pixel = jnp.maximum(x, 0.0) - x * t + jnp.log1p(jnp.exp(-jnp.abs(x)))
    weighted = pixel * (1.0 + boundary_weight * boundary)

    # un-normalized partial sum, reduced over sublanes only -> lane-dense row;
    # the final cross-lane sum and the divide happen once, in the wrapper.
    out_ref[0] = jnp.sum(weighted, axis=0, keepdims=True)


def _round_up(a, b):
    return -(-a // b) * b


def _vmem_capacity_bytes():
    try:
        return int(pltpu.get_tpu_info().vmem_capacity_bytes)
    except Exception:
        return 0  # unknown -> use the conservative (small-VMEM) settings


def boundary_loss(predict, target, boundary_weight=5.0):
    """predict, target: (B, 1, H, W). Any float/int dtype (upcast happens
    in-kernel, so bf16 predict / uint8 target cut HBM traffic). Returns f32."""
    B, C, H, W = predict.shape
    assert C == 1 and target.shape == predict.shape
    total_real = B * H * W

    # --- lane packing: G images side-by-side along lanes so the last dim is
    # (close to) a full 128-lane vreg. Batch is zero-padded up to the packing
    # granularity; the padded pixels' exact contribution is removed later.
    G = max(1, 128 // W) if W < 128 else 1
    GW = G * W
    N = _round_up(B, G) // G                   # packed "super images"

    # --- row-block selection: TB super-images per grid step.
    #   * TB*H % 8 == 0 (sublane alignment) unless the block is the full slab
    #   * per-input block bytes stay under a generation-aware VMEM budget
    #   * keep >= 8 grid steps so both v7x TensorCores get work and the
    #     double-buffered DMA pipeline has something to overlap
    _DESIRED_BLOCKS = 8
    big_vmem = _vmem_capacity_bytes() >= 96 * 1024 * 1024     # v5e / v6e
    budget = (6 if big_vmem else 3) * 1024 * 1024             # per-input block
    vmem_limit = (100 if big_vmem else 48) * 1024 * 1024

    itemsize = max(jnp.dtype(predict.dtype).itemsize,
                   jnp.dtype(target.dtype).itemsize)
    bytes_per_simage = H * GW * itemsize
    tb_align = 8 // math.gcd(H, 8)
    tb_budget = max(1, budget // bytes_per_simage)
    tb_parallel = max(1, -(-N // _DESIRED_BLOCKS))
    TB = max(1, min(tb_budget, tb_parallel))
    TB = min(_round_up(TB, tb_align), _round_up(N, tb_align))
    num_blocks = -(-N // TB)
    if num_blocks == 1:
        TB = N           # single full-extent block: no sublane alignment needed
    N_pad = num_blocks * TB

    pad_imgs = N_pad * G - B                    # all-zero padded images

    def pack(a):
        a = a.reshape(B, H, W)
        if pad_imgs > 0:
            a = jnp.pad(a, ((0, pad_imgs), (0, 0), (0, 0)))
        if G > 1:
            a = a.reshape(N_pad, G, H, W).transpose(0, 2, 1, 3)
        return a.reshape(N_pad * H, GW)         # 2-D lane-dense slab, same dtype

    p2 = pack(predict)
    t2 = pack(target)

    # TODO(synk): pass boundary_weight via an SMEM scalar if it varies at
    # runtime (each distinct static value currently triggers a recompile).
    kernel = functools.partial(_boundary_loss_kernel, H=H, W=W, G=G,
                               boundary_weight=float(boundary_weight))

    partial_sums = pl.pallas_call(
        kernel,
        out_shape=jax.ShapeDtypeStruct((num_blocks, 1, GW), jnp.float32),
        grid=(num_blocks,),
        in_specs=[
            pl.BlockSpec((TB * H, GW), lambda n: (n, 0)),
            pl.BlockSpec((TB * H, GW), lambda n: (n, 0)),
        ],
        out_specs=pl.BlockSpec((1, 1, GW), lambda n: (n, 0, 0)),
        compiler_params=pltpu.CompilerParams(
            dimension_semantics=("parallel",),
            vmem_limit_bytes=vmem_limit,
        ),
    )(p2, t2)

    raw = jnp.sum(partial_sums)
    if pad_imgs > 0:
        # each all-zero padded pixel (pred=0, tgt=0, boundary=0) contributes
        # exactly log1p(exp(0)) = ln 2 to the kernel's sum -> subtract exactly.
        pad_unit = jnp.log1p(jnp.exp(jnp.float32(0.0)))
        raw = raw - jnp.float32(pad_imgs * H * W) * pad_unit
    return raw / jnp.float32(total_real)


def _reference_loss(predict, target, boundary_weight=5.0):
    """Pure-JAX reference mirroring the PyTorch/scipy semantics."""
    t = target.astype(jnp.float32)
    x = predict.astype(jnp.float32)
    B, C, H, W = t.shape

    def shifted(a, dy, dx):
        a = jnp.roll(a, (dy, dx), axis=(2, 3))
        r = jnp.arange(H)[:, None]
        c = jnp.arange(W)[None, :]
        mask = jnp.ones((H, W), bool)
        if dy > 0:
            mask &= r >= dy
        if dy < 0:
            mask &= r < H + dy
        if dx > 0:
            mask &= c >= dx
        if dx < 0:
            mask &= c < W + dx
        return jnp.where(mask, a, 0.0)

    fg = t != 0
    eroded = (
        fg
        & (shifted(t, 1, 0) != 0)
        & (shifted(t, -1, 0) != 0)
        & (shifted(t, 0, 1) != 0)
        & (shifted(t, 0, -1) != 0)
    ).astype(jnp.float32)
    boundary = t - eroded
    pixel = jnp.maximum(x, 0.0) - x * t + jnp.log1p(jnp.exp(-jnp.abs(x)))
    return jnp.mean(pixel * (1.0 + boundary_weight * boundary))


if __name__ == "__main__":
    key = jax.random.PRNGKey(0)
    cases = [
        (8, 16, 16),     # lane packing G=8, single full block
        (5, 24, 20),     # non-power-of-two W, batch padded to a multiple of G=6
        (4, 128, 160),   # W >= 128 (no packing), multi-block parallel grid
    ]
    for (B, H, W) in cases:
        key, k_pred, k_tgt = jax.random.split(key, 3)
        predict = jax.random.normal(k_pred, (B, 1, H, W), dtype=jnp.float32)
        target = jax.random.bernoulli(k_tgt, p=0.5,
                                      shape=(B, 1, H, W)).astype(jnp.float32)

        loss = jax.block_until_ready(
            boundary_loss(predict, target, boundary_weight=5.0))
        ref = jax.block_until_ready(
            _reference_loss(predict, target, boundary_weight=5.0))
        assert jnp.allclose(loss, ref, rtol=1e-5, atol=1e-5), (B, H, W, loss, ref)

    print("KERNEL_OK")
</pallas_src>

<mosaic_0001>
module attributes {stable_mosaic.version = 11 : i64} {
  func.func @_boundary_loss_kernel(%arg0: i32, %arg1: memref<16x128xf32, #tpu.memory_space<vmem>>, %arg2: memref<16x128xf32, #tpu.memory_space<vmem>>, %arg3: memref<1x1x128xf32, #tpu.memory_space<vmem>>) attributes {dimension_semantics = [#tpu.dimension_semantics<parallel>], iteration_bounds = array<i64: 1>, scalar_prefetch = 0 : i64, scratch_operands = 0 : i64, tpu.core_type = #tpu.core_type<tc>, window_params = [{transform_indices = @transform_0, window_bounds = array<i64: 16, 128>}, {transform_indices = @transform_1, window_bounds = array<i64: 16, 128>}, {transform_indices = @transform_2, window_bounds = array<i64: 1, 1, 128>}]} {
    %c0 = arith.constant 0 : index
    %c0_0 = arith.constant 0 : index
    %0 = vector.load %arg2[%c0, %c0_0] : memref<16x128xf32, #tpu.memory_space<vmem>>, vector<16x128xf32>
    %1 = tpu.iota {dimensions = array<i32: 1>} : vector<16x128xi32>
    %c15_i32 = arith.constant 15 : i32
    %2 = vector.broadcast %c15_i32 : i32 to vector<16x128xi32>
    %3 = arith.andi %1, %2 : vector<16x128xi32>
    %c0_i32 = arith.constant 0 : i32
    %4 = vector.broadcast %c0_i32 : i32 to vector<16x128xi32>
    %5 = arith.cmpi sgt, %3, %4 : vector<16x128xi32>
    %c15_i32_1 = arith.constant 15 : i32
    %6 = vector.broadcast %c15_i32_1 : i32 to vector<16x128xi32>
    %7 = arith.cmpi slt, %3, %6 : vector<16x128xi32>
    %8 = arith.andi %5, %7 : vector<16x128xi1>
    %9 = tpu.iota {dimensions = array<i32: 0>} : vector<16x128xi32>
    %c15_i32_2 = arith.constant 15 : i32
    %10 = vector.broadcast %c15_i32_2 : i32 to vector<16x128xi32>
    %11 = arith.andi %9, %10 : vector<16x128xi32>
    %c0_i32_3 = arith.constant 0 : i32
    %12 = vector.broadcast %c0_i32_3 : i32 to vector<16x128xi32>
    %13 = arith.cmpi sgt, %11, %12 : vector<16x128xi32>
    %c15_i32_4 = arith.constant 15 : i32
    %14 = vector.broadcast %c15_i32_4 : i32 to vector<16x128xi32>
    %15 = arith.cmpi slt, %11, %14 : vector<16x128xi32>
    %16 = arith.andi %13, %15 : vector<16x128xi1>
    %17 = arith.andi %16, %8 : vector<16x128xi1>
    %cst = arith.constant 0.000000e+00 : f32
    %18 = vector.broadcast %cst : f32 to vector<16x128xf32>
    %19 = arith.cmpf one, %0, %18 : vector<16x128xf32>
    %20 = arith.andi %17, %19 : vector<16x128xi1>
    %c1_i32 = arith.constant 1 : i32
    %21 = tpu.dynamic_rotate %0 by %c1_i32 dim 0 : vector<16x128xf32>, i32 -> vector<16x128xf32>
    %cst_5 = arith.constant 0.000000e+00 : f32
    %22 = vector.broadcast %cst_5 : f32 to vector<16x128xf32>
    %23 = arith.cmpf one, %21, %22 : vector<16x128xf32>
    %24 = arith.andi %20, %23 : vector<16x128xi1>
    %c15_i32_6 = arith.constant 15 : i32
    %25 = tpu.dynamic_rotate %0 by %c15_i32_6 dim 0 : vector<16x128xf32>, i32 -> vector<16x128xf32>
    %cst_7 = arith.constant 0.000000e+00 : f32
    %26 = vector.broadcast %cst_7 : f32 to vector<16x128xf32>
    %27 = arith.cmpf one, %25, %26 : vector<16x128xf32>
    %28 = arith.andi %24, %27 : vector<16x128xi1>
    %c1_i32_8 = arith.constant 1 : i32
    %29 = tpu.dynamic_rotate %0 by %c1_i32_8 dim 1 : vector<16x128xf32>, i32 -> vector<16x128xf32>
    %cst_9 = arith.constant 0.000000e+00 : f32
    %30 = vector.broadcast %cst_9 : f32 to vector<16x128xf32>
    %31 = arith.cmpf one, %29, %30 : vector<16x128xf32>
    %32 = arith.andi %28, %31 : vector<16x128xi1>
    %c127_i32 = arith.constant 127 : i32
    %33 = tpu.dynamic_rotate %0 by %c127_i32 dim 1 : vector<16x128xf32>, i32 -> vector<16x128xf32>
    %cst_10 = arith.constant 0.000000e+00 : f32
    %34 = vector.broadcast %cst_10 : f32 to vector<16x128xf32>
    %35 = arith.cmpf one, %33, %34 : vector<16x128xf32>
    %36 = arith.andi %32, %35 : vector<16x128xi1>
    %37 = arith.extui %36 : vector<16x128xi1> to vector<16x128xi32>
    %38 = arith.sitofp %37 : vector<16x128xi32> to vector<16x128xf32>
    %39 = arith.subf %0, %38 : vector<16x128xf32>
    %c0_11 = arith.constant 0 : index
    %c0_12 = arith.constant 0 : index
    %40 = vector.load %arg1[%c0_11, %c0_12] : memref<16x128xf32, #tpu.memory_space<vmem>>, vector<16x128xf32>
    %cst_13 = arith.constant 0.000000e+00 : f32
    %41 = vector.broadcast %cst_13 : f32 to vector<16x128xf32>
    %42 = arith.maximumf %40, %41 : vector<16x128xf32>
    %43 = arith.mulf %40, %0 : vector<16x128xf32>
    %44 = arith.subf %42, %43 : vector<16x128xf32>
    %45 = math.absf %40 : vector<16x128xf32>
    %cst_14 = arith.constant 0.000000e+00 : f32
    %46 = vector.broadcast %cst_14 : f32 to vector<16x128xf32>
    %47 = arith.subf %46, %45 : vector<16x128xf32>
    %48 = math.exp %47 : vector<16x128xf32>
    %49 = math.log1p %48 : vector<16x128xf32>
    %50 = arith.addf %44, %49 : vector<16x128xf32>
    %cst_15 = arith.constant 5.000000e+00 : f32
    %51 = vector.broadcast %cst_15 : f32 to vector<16x128xf32>
    %52 = arith.mulf %51, %39 : vector<16x128xf32>
    %cst_16 = arith.constant 1.000000e+00 : f32
    %53 = vector.broadcast %cst_16 : f32 to vector<16x128xf32>
    %54 = arith.addf %53, %52 : vector<16x128xf32>
    %55 = arith.mulf %50, %54 : vector<16x128xf32>
    %cst_17 = arith.constant dense<0.000000e+00> : vector<128xf32>
    %56 = vector.multi_reduction <add>, %55, %cst_17 [0] : vector<16x128xf32> to vector<128xf32>
    %57 = vector.shape_cast %56 : vector<128xf32> to vector<1x128xf32>
    %c0_18 = arith.constant 0 : index
    %c0_19 = arith.constant 0 : index
    %c0_20 = arith.constant 0 : index
    %58 = vector.load %arg3[%c0_18, %c0_19, %c0_20] : memref<1x1x128xf32, #tpu.memory_space<vmem>>, vector<1x1x128xf32>
    %59 = vector.shape_cast %58 : vector<1x1x128xf32> to vector<1x128xf32>
    %60 = vector.shape_cast %57 : vector<1x128xf32> to vector<1x1x128xf32>
    tpu.vector_store %arg3[%c0_18, %c0_19, %c0_20], %60 {strides = array<i32>} : memref<1x1x128xf32, #tpu.memory_space<vmem>>, vector<1x1x128xf32>,
    return
  }
  func.func @transform_0(%arg0: i32) -> (i32, i32) {
    %c0_i32 = arith.constant 0 : i32
    %c0_i32_0 = arith.constant 0 : i32
    return %arg0, %c0_i32 : i32, i32
  }
  func.func @transform_1(%arg0: i32) -> (i32, i32) {
    %c0_i32 = arith.constant 0 : i32
    %c0_i32_0 = arith.constant 0 : i32
    return %arg0, %c0_i32 : i32, i32
  }
  func.func @transform_2(%arg0: i32) -> (i32, i32, i32) {
    %c0_i32 = arith.constant 0 : i32
    %c0_i32_0 = arith.constant 0 : i32
    %c0_i32_1 = arith.constant 0 : i32
    return %arg0, %c0_i32, %c0_i32_0 : i32, i32, i32
  }
}

</mosaic_0001>

<bundles_post_ra>
// kernel: tpu_custom_call.1
= control target key start
LH: loop header
LB: loop body
LE: loop exit
PB: predicated region body
PF: predicated region fallthrough
CT: control target
= control target key end

     0   :  { %7 = vsyncpa [#allocation3], 0  ;;  %s378_s0 = inlined_call_operand.hbm [shape: f32[16,128], index: 0, kind: input, shape index: {}]   ;;  %s379_s1 = inlined_call_operand.hbm [shape: f32[16,128], index: 1, kind: input, shape index: {}]   ;;  %s380_s2 = inlined_call_operand.hbm [shape: f32[1,1,128], index: 2, kind: output, shape index: {}]  }
   0x1   :  { %8 = vsyncpa [#allocation6], 0 }
   0x2   :  { %9 = vsyncpa [#allocation4], 0  ;;  %s261_s9 = smov [#allocation2]   ;;  %s189_s13 = scalar_lea.hbm %s378_s0, 256 }
   0x3   :  { %s15_s10 = sshll.u32 %s261_s9, 4  ;;  %p190_p0 = scmp.ne.s32.totalorder %s378_s0, %s189_s13  ;;  %s16_s10 = int_to_ptr.vmem [resolvable:$true] %s15_s10 }
   0x4   :  { %p193_p1 = scmp.lt.u32.totalorder %s189_s13, %s378_s0 }
   0x6   :  { %p195_p2 = pnand %p193_p1, %p190_p0 }
   0x8   :  { %198 = shalt.err (!%p195_p2)
}
   0x9   :  { %s199_s18 = scalar_lea.vmem %s16_s10, 256  ;;  %p204_p4 = scmp.lt.s32.totalorder %s16_s10, %s16_s10 }
   0xa   :  { %p200_p3 = scmp.ne.s32.totalorder %s16_s10, %s199_s18  ;;  %p205_p5 = scmp.lt.s32.totalorder %s199_s18, %s199_s18 }
   0xc   :  { %p206_p6 = por %p205_p5, %p204_p4 }
   0xe   :  { %p207_p7 = pnand %p206_p6, %p200_p3 }
  0x10   :  { %210 = shalt.err (!%p207_p7)
}
  0x11   :  { %s262_s19 = smov 128   ;;  %s263_s20 = smov 8  }
  0x12   :  { %21 = dma.hbm_to_vmem [thread:$0]  %s378_s0, 256, %s16_s10, [#allocation3], %s262_s19, %s262_s19, %s263_s20  }
  0x13   :  { %s264_s23 = smov [#allocation5]   ;;  %s211_s27 = scalar_lea.hbm %s379_s1, 256 }
  0x14   :  { %s27_s24 = sshll.u32 %s264_s23, 4  ;;  %p212_p8 = scmp.ne.s32.totalorder %s379_s1, %s211_s27  ;;  %s28_s24 = int_to_ptr.vmem [resolvable:$true] %s27_s24 }
  0x15   :  { %p215_p9 = scmp.lt.u32.totalorder %s211_s27, %s379_s1 }
  0x17   :  { %p217_p10 = pnand %p215_p9, %p212_p8 }
  0x19   :  { %220 = shalt.err (!%p217_p10)
}
  0x1a   :  { %s221_s4 = scalar_lea.vmem %s28_s24, 256  ;;  %p226_p12 = scmp.lt.s32.totalorder %s28_s24, %s28_s24 }
  0x1b   :  { %p222_p11 = scmp.ne.s32.totalorder %s28_s24, %s221_s4  ;;  %p227_p13 = scmp.lt.s32.totalorder %s221_s4, %s221_s4 }
  0x1d   :  { %p228_p0 = por %p227_p13, %p226_p12 }
  0x1f   :  { %p229_p1 = pnand %p228_p0, %p222_p11 }
  0x21   :  { %232 = shalt.err (!%p229_p1)
}
  0x22   :  { %33 = dma.hbm_to_vmem [thread:$0]  %s379_s1, 256, %s28_s24, [#allocation6], %s262_s19, %s262_s19, %s263_s20  }
  0x23   :  { %255 = dma.done.wait [#allocation3], 256  }
  0x24   :  { %256 = vsyncadd [#allocation3], 4294967040 }
  0x25   :  { %257 = dma.done.wait [#allocation6], 256  }
  0x26   :  { %258 = vsyncadd [#allocation6], 4294967040  ;;  %v308_v0 = vld [vmem:[#allocation5] sm:$0xff]  ;;  %s265_s6 = smov 1   ;;  %s266_s7 = smov 127   ;;  %v312_v1 = vld [vmem:[#allocation5 + $0x8] sm:$0xff]  ;;  %v42_v10 = vlaneseq }
  0x27   :  { %83 = vrot.lane.b32.xlu0 %v308_v0, %s265_s6  ;;  %91 = vrot.lane.b32.xlu1 %v308_v0, %s266_s7  ;;  %v316_v2 = vld [vmem:[#allocation2] sm:$0xff]  ;;  %v318_v3 = vld [vmem:[#allocation2 + $0x8] sm:$0xff]  ;;  %v66_v21 = vrot.slane %v312_v1, 7  ;;  %v65_v22 = vrot.slane %v308_v0, 7  ;;  %v75_v25 = vrot.slane %v312_v1, 1  ;;  %v74_v26 = vrot.slane %v308_v0, 1 }
  0x28   :  { %v113_v4 = vand.u32 2147483647, %v316_v2  ;;  %v114_v5 = vand.u32 2147483647, %v318_v3  ;;  %v43_v11 = vand.u32 127, %v42_v10  ;;  %v49_v12 = vshrl.u32 %v42_v10, 7 }
  0x29   :  { %vm61_vm8 = vcmp.ne.f32.partialorder %v308_v0, 0.0  ;;  %vm62_vm10 = vcmp.ne.f32.partialorder %v312_v1, 0.0  ;;  %v107_v42 = vmax.f32 %v316_v2, 0.0  ;;  %v109_v43 = vmul.f32 %v316_v2, %v308_v0  ;;  %s268_s1 = smov [#allocation7]  }
  0x2a   :  { %v115_v6 = vsub.f32 0.0, %v113_v4  ;;  %v116_v7 = vsub.f32 0.0, %v114_v5  ;;  %v44_v13 = vand.u32 15, %v43_v11  ;;  %v50_v14 = vadd.s32 8, %v49_v12  ;;  %s161_s8 = sshll.u32 %s268_s1, 4  ;;  %s162_s8 = int_to_ptr.vmem [resolvable:$true] %s161_s8 }
  0x2b   :  { %85 = vrot.lane.b32.xlu0 %v312_v1, %s265_s6  ;;  %93 = vrot.lane.b32.xlu1 %v312_v1, %s266_s7  ;;  %v51_v16 = vand.u32 15, %v49_v12  ;;  %vm67_vm4 = vcmp.lt.s32.totalorder %v49_v12, 1  ;;  %vm76_vm7 = vcmp.lt.s32.totalorder %v49_v12, 7  ;;  %v108_v46 = vmax.f32 %v318_v3, 0.0  ;;  %s233_s9 = scalar_lea.vmem %s162_s8, 16  ;;  %s237_s10 = scalar_lea.vmem %s162_s8, 32 }
  0x2c   :  { %v117_v8 = vmul.f32 1.442695, %v115_v6  ;;  %v119_v9 = vmul.f32 1.442695, %v116_v7  ;;  %vm324_vm0 = vcmp.gt.s32.totalorder %v44_v13, 0  ;;  %vm328_vm1 = vcmp.lt.s32.totalorder %v44_v13, 15  ;;  %p234_p2 = scmp.ne.s32.totalorder %s162_s8, %s233_s9  ;;  %p238_p3 = scmp.lt.s32.totalorder %s162_s8, %s162_s8 }
  0x2d   :  { %v52_v20 = vand.u32 15, %v50_v14  ;;  %vm47_vm2 = vmand %vm324_vm0, %vm328_vm1  ;;  %vm53_vm3 = vcmp.gt.s32.totalorder %v51_v16, 0  ;;  %v69_v27 = vsel %vm67_vm4, %v66_v21, %v65_v22  ;;  %v68_v28 = vsel %vm67_vm4, %v65_v22, %v66_v21  ;;  %p239_p4 = scmp.lt.s32.totalorder %s237_s10, %s233_s9 }
  0x2e   :  { %181 = vpow2.f32 %v117_v8  ;;  %vm59_vm6 = vmand %vm53_vm3, %vm47_vm2  ;;  %vm70_vm12 = vcmp.ne.f32.partialorder %v69_v27, 0.0  ;;  %v77_v29 = vsel %vm76_vm7, %v74_v26, %v75_v25  ;;  %vm71_vm14 = vcmp.ne.f32.partialorder %v68_v28, 0.0 }
  0x2f   :  { %183 = vpow2.f32 %v119_v9  ;;  %vm56_vm5 = vcmp.lt.s32.totalorder %v52_v20, 15  ;;  %vm63_vm11 = vmand %vm59_vm6, %vm61_vm8  ;;  %v78_v31 = vsel %vm76_vm7, %v75_v25, %v74_v26  ;;  %vm79_vm0 = vcmp.ne.f32.partialorder %v77_v29, 0.0  ;;  %p240_p5 = por %p239_p4, %p238_p3 }
  0x30   :  { %vm60_vm9 = vmand %vm56_vm5, %vm47_vm2  ;;  %vm80_vm3 = vcmp.ne.f32.partialorder %v78_v31, 0.0  ;;  %v110_v47 = vmul.f32 %v318_v3, %v312_v1  ;;  %v267_v49 = vmov 0.0   ;;  %v111_v56 = vsub.f32 %v107_v42, %v109_v43 }
  0x31   :  { %vm64_vm13 = vmand %vm60_vm9, %vm62_vm10  ;;  %p241_p6 = pnand %p240_p5, %p234_p2 }
  0x32   :  { %vm72_vm15 = vmand %vm63_vm11, %vm70_vm12  ;;  %v112_v58 = vsub.f32 %v108_v46, %v110_v47 }
  0x33   :  { %vm73_vm1 = vmand %vm64_vm13, %vm71_vm14 }
  0x34   :  { %vm81_vm2 = vmand %vm72_vm15, %vm79_vm0 }
  0x35   :  { %vm344_vm6 = vmand %vm73_vm1, %vm80_vm3 }
  0x38   :  { %v182_v15 = vpop.eup %181 }
  0x39   :  { %v322_v17 = vpop.eup %183  ;;  %v121_v23 = vadd.f32 1.0, %v182_v15  ;;  %v124_v30 = vmul.f32 -0.5, %v182_v15  ;;  %v127_v34 = vand.u32 2147483647, %v182_v15 }
  0x3a   :  { %v130_v24 = vadd.f32 1.0, %v322_v17  ;;  %v133_v32 = vmul.f32 -0.5, %v322_v17  ;;  %v136_v41 = vand.u32 2147483647, %v322_v17 }
  0x3b   :  { %185 = vlog2.f32 %v121_v23  ;;  %v125_v33 = vadd.f32 1.0, %v124_v30  ;;  %vm352_vm8 = vcmp.lt.f32.partialorder %v127_v34, 0.0004427343 }
  0x3c   :  { %187 = vlog2.f32 %v130_v24  ;;  %v134_v38 = vadd.f32 1.0, %v133_v32  ;;  %vm137_vm11 = vcmp.lt.f32.partialorder %v136_v41, 0.0004427343 }
  0x3d   :  { %v126_v44 = vmul.f32 %v182_v15, %v125_v33 }
  0x3e   :  { %v135_v53 = vmul.f32 %v322_v17, %v134_v38 }
  0x45   :  { %v186_v35 = vpop.eup %185 }
  0x46   :  { %v188_v39 = vpop.eup %187  ;;  %v123_v48 = vmul.f32 0.6931472, %v186_v35 }
  0x47   :  { %v132_v52 = vmul.f32 0.6931472, %v188_v39 }
  0x48   :  { %v129_v59 = vsel %vm352_vm8, %v126_v44, %v123_v48 }
  0x49   :  { %v138_v60 = vsel %vm137_vm11, %v135_v53, %v132_v52  ;;  %v139_v63 = vadd.f32 %v129_v59, %v111_v56 }
  0x99   :  { %v84_v36 = vpop.permute.xlu0 %83  ;;  %v92_v37 = vpop.permute.xlu1 %91 }
  0x9a   :  { %vm87_vm4 = vcmp.ne.f32.partialorder %v84_v36, 0.0  ;;  %vm95_vm5 = vcmp.ne.f32.partialorder %v92_v37, 0.0 }
  0x9b   :  { %vm89_vm7 = vmand %vm81_vm2, %vm87_vm4 }
  0x9c   :  { %vm97_vm9 = vmand %vm89_vm7, %vm95_vm5 }
  0x9d   :  { %v171_v50 = vsel %vm97_vm9, 1.0, %v267_v49  ;;  %v86_v51 = vpop.permute.xlu0 %85  ;;  %v94_v54 = vpop.permute.xlu1 %93 }
  0x9e   :  { %v103_v55 = vsub.f32 %v308_v0, %v171_v50  ;;  %vm88_vm10 = vcmp.ne.f32.partialorder %v86_v51, 0.0  ;;  %vm96_vm12 = vcmp.ne.f32.partialorder %v94_v54, 0.0  ;;  %v140_v0 = vadd.f32 %v138_v60, %v112_v58 }
  0x9f   :  { %vm90_vm13 = vmand %vm344_vm6, %vm88_vm10 }
  0xa0   :  { %v141_v57 = vmul.f32 5.0, %v103_v55  ;;  %vm98_vm14 = vmand %vm90_vm13, %vm96_vm12 }
  0xa1   :  { %v172_v61 = vsel %vm98_vm14, 1.0, %v267_v49 }
  0xa2   :  { %v104_v62 = vsub.f32 %v312_v1, %v172_v61  ;;  %v143_v2 = vadd.f32 1.0, %v141_v57 }
  0xa4   :  { %v142_v3 = vmul.f32 5.0, %v104_v62  ;;  %v145_v5 = vmul.f32 %v143_v2, %v139_v63 }
  0xa6   :  { %v144_v4 = vadd.f32 1.0, %v142_v3 }
  0xa8   :  { %v146_v6 = vmul.f32 %v144_v4, %v140_v0 }
  0xaa   :  { %v147_v7 = vadd.f32 %v146_v6, %v145_v5 }
  0xac   :  { %v148_v8 = vrot.slane %v147_v7, 4 }
  0xae   :  { %v149_v9 = vadd.f32 %v148_v8, %v147_v7 }
  0xb0   :  { %v150_v10 = vrot.slane %v149_v9, 2 }
  0xb2   :  { %v151_v11 = vadd.f32 %v150_v10, %v149_v9 }
  0xb4   :  { %v152_v12 = vrot.slane %v151_v11, 1 }
  0xb6   :  { %v153_v13 = vadd.f32 %v152_v12, %v151_v11 }
  0xb8   :  { %154 = vst [vmem:[#allocation7] sm:$0x1] %v153_v13 }
  0xb9   :  { %244 = shalt.err (!%p241_p6)
}
  0xba   :  { %s245_s13 = scalar_lea.hbm %s380_s2, 16 }
  0xbb   :  { %p246_p7 = scmp.ne.s32.totalorder %s380_s2, %s245_s13  ;;  %p249_p8 = scmp.lt.u32.totalorder %s245_s13, %s380_s2 }
  0xbd   :  { %p251_p9 = pnand %p249_p8, %p246_p7 }
  0xbf   :  { %254 = shalt.err (!%p251_p9)
}
  0xc0   :  { %164 = dma.vmem_to_hbm [thread:$0]  %s162_s8, 16, %s380_s2, [#allocation4]  }
  0xc1   :  { %259 = dma.done.wait [#allocation4], 16  }
  0xc2   :  { %260 = vsyncadd [#allocation4], 4294967280 }
  0xc3   :  { %168 = vsyncpa [#allocation3], 1 }
  0xc4   :  { %169 = vsyncpa [#allocation6], 1 }
  0xc5   :  { %170 = vsyncpa [#allocation4], 1 }

</bundles_post_ra>
